<compile_context>
chip_gen: v7x
topology: tpu7x:2x2x1
jax: 0.10.0
libtpu: 0.0.40
codegen_flags: <defaults>
</compile_context>

<pallas_src>
import functools

import jax
import jax.numpy as jnp
from jax.experimental import pallas as pl
from jax.experimental.pallas import tpu as pltpu


NEG_SLOPE = 0.01  # F.leaky_relu default negative_slope
FOLD = 4          # batch rows folded into lanes; 4 * input_size(32) = 128 lanes


def _leaky_relu(x):
    # For 0 < slope < 1 this equals where(x > 0, x, slope*x): one mul + one max.
    return jnp.maximum(x, NEG_SLOPE * x)


def _round_up(x, m):
    return ((x + m - 1) // m) * m


def _cdiv(a, b):
    return (a + b - 1) // b


def forward_model_kernel(act_ref, state_ref,
                         w1_ref, b1_ref,
                         w2_ref, b2_ref,
                         ws_ref, bs_ref,
                         wds_ref, wda_ref, bd_ref,
                         out_ref):
    # Activations may be streamed in bf16; upcast once and keep all
    # elementwise math in f32 (important on v5e: no bf16 VPU/EUP).
    act = act_ref[...].astype(jnp.float32)
    state = state_ref[...].astype(jnp.float32)

    # act path: Linear(action_space, 16) -> leaky_relu -> Linear(16, D) -> leaky_relu
    h1 = _leaky_relu(
        jnp.dot(act, w1_ref[...], preferred_element_type=jnp.float32)
        + b1_ref[...])
    h2 = _leaky_relu(
        jnp.dot(h1, w2_ref[...], preferred_element_type=jnp.float32)
        + b2_ref[...])

    # state path: Linear(D, D) -> leaky_relu
    s = _leaky_relu(
        jnp.dot(state, ws_ref[...], preferred_element_type=jnp.float32)
        + bs_ref[...])

    # dense1 on cat((state, act)) without the concatenate:
    #   cat @ [Wd_s; Wd_a] == s @ Wd_s + h2 @ Wd_a
    out = (jnp.dot(s, wds_ref[...], preferred_element_type=jnp.float32)
           + jnp.dot(h2, wda_ref[...], preferred_element_type=jnp.float32)
           + bd_ref[...])
    out_ref[...] = out.astype(out_ref.dtype)


@functools.partial(jax.jit, static_argnames=("tb", "fold", "in_dtype"))
def forward_model(act, state, kparams, *, tb=2048, fold=FOLD,
                  in_dtype=jnp.bfloat16):
    """act: (B, action_space), state: (B, D) -> (B, D) float32.

    `kparams` must come from prepare_kernel_params(params, fold) with the same
    `fold`.  Inputs are streamed as `in_dtype` (bf16 by default); ideally the
    caller already produces bf16 so the cast is a no-op.
    """
    B, A = act.shape
    D = state.shape[1]
    (w1, b1, w2, b2, ws, bs, wd_s, wd_a, bd) = kparams

    # Only pad up to a multiple of `fold` (<= fold-1 rows).  The previous
    # pad-to-tile full-HBM copy is gone: ragged batch tiles are handled by a
    # cdiv grid (out-of-bounds rows are masked on the store).
    Bp = _round_up(B, fold)
    if Bp != B:
        pad = Bp - B
        act = jnp.pad(act, ((0, pad), (0, 0)))
        state = jnp.pad(state, ((0, pad), (0, 0)))
    Bf = Bp // fold

    # Fold `fold` batch rows into the lane axis (free row-major reshape) so
    # every tile is lane-dense (128 lanes at D=32) and the output store is an
    # unmasked full-lane vst.
    act_f = act.reshape(Bf, fold * A).astype(in_dtype)
    state_f = state.reshape(Bf, fold * D).astype(in_dtype)

    # Batch tile (in folded rows): as big as possible (amortize per-step
    # overhead), multiple of 16 (bf16 sublane packing).  Split into >=2 grid
    # steps when there is enough work so both v7x TensorCores get a share of
    # the "parallel" axis (neutral on single-core v5e/v6e).
    TB = min(tb, _round_up(Bf, 16))
    if Bf >= 32 and TB >= Bf:
        TB = _round_up(_cdiv(Bf, 2), 16)
    if TB > Bf:
        TB = Bf                      # single block == full batch dim (allowed)
    grid = (_cdiv(Bf, TB),)

    # Explicit scoped-VMEM budget so large batch tiles compile on all
    # generations (default scoped limit is 16 MiB on v5e / 32 MiB on v6e/v7x).
    in_bytes = TB * fold * (A + D) * jnp.dtype(in_dtype).itemsize
    out_bytes = TB * fold * D * 4
    w_bytes = sum(int(a.size) * a.dtype.itemsize
                  for a in (w1, b1, w2, b2, ws, bs, wd_s, wd_a, bd))
    tmp_bytes = TB * fold * (16 + 3 * D) * 4     # h1/h2/s/out f32 temporaries
    est = 2 * (in_bytes + out_bytes) + 2 * w_bytes + tmp_bytes
    vmem_limit = int(min(max(2 * est, 32 * 1024 * 1024), 64 * 1024 * 1024))

    def bspec(feat):
        return pl.BlockSpec((TB, feat), lambda i: (i, 0))

    def wspec(arr):
        # Grid-invariant weights: constant block index -> fetched once.
        return pl.BlockSpec(arr.shape, lambda i: (0, 0))

    out_f = pl.pallas_call(
        forward_model_kernel,
        out_shape=jax.ShapeDtypeStruct((Bf, fold * D), jnp.float32),
        grid=grid,
        in_specs=[
            bspec(fold * A),          # folded act
            bspec(fold * D),          # folded state
            wspec(w1), wspec(b1),
            wspec(w2), wspec(b2),
            wspec(ws), wspec(bs),
            wspec(wd_s), wspec(wd_a), wspec(bd),
        ],
        out_specs=pl.BlockSpec((TB, fold * D), lambda i: (i, 0)),
        compiler_params=pltpu.CompilerParams(
            dimension_semantics=("parallel",),
            vmem_limit_bytes=vmem_limit),
    )(act_f, state_f, w1, b1, w2, b2, ws, bs, wd_s, wd_a, bd)

    out = out_f.reshape(Bp, D)        # un-fold (free reshape)
    return out[:B] if Bp != B else out


def init_params(key, input_size, action_space):
    """Logical parameters mirroring the torch module.  Linear weights stored
    pre-transposed as (in_features, out_features); biases as (1, out)."""
    ks = jax.random.split(key, 8)

    def lin(kw, kb, fan_in, fan_out):
        bound = 1.0 / jnp.sqrt(jnp.float32(fan_in))
        w = jax.random.uniform(kw, (fan_in, fan_out), jnp.float32, -bound, bound)
        b = jax.random.uniform(kb, (1, fan_out), jnp.float32, -bound, bound)
        return w, b

    w1, b1 = lin(ks[0], ks[1], action_space, 16)            # act_in1
    w2, b2 = lin(ks[2], ks[3], 16, input_size)              # act_in2
    ws, bs = lin(ks[4], ks[5], input_size, input_size)      # state_in1
    wd, bd = lin(ks[6], ks[7], input_size * 2, input_size)  # dense1
    return (w1, b1, w2, b2, ws, bs, wd, bd)


def prepare_kernel_params(params, fold=FOLD):
    """One-time packing for the lane-folded kernel: each weight becomes a
    fold-way block-diagonal matrix (kron(I_fold, W)), biases are tiled, and
    dense1's weight is pre-split into its (state, act) halves."""
    (w1, b1, w2, b2, ws, bs, wd, bd) = params
    D = ws.shape[0]
    eye = jnp.eye(fold, dtype=jnp.float32)

    def bdiag(w):
        return jnp.kron(eye, w)

    def btile(b):
        return jnp.tile(b, (1, fold))

    wd_s, wd_a = wd[:D], wd[D:]
    return (bdiag(w1), btile(b1),
            bdiag(w2), btile(b2),
            bdiag(ws), btile(bs),
            bdiag(wd_s), bdiag(wd_a), btile(bd))


def forward_model_ref(act, state, params):
    """Pure-JAX reference mirroring the original torch module (with cat)."""
    (w1, b1, w2, b2, ws, bs, wd, bd) = params

    def lrelu(x):
        return jnp.where(x > 0, x, NEG_SLOPE * x)

    a = lrelu(act @ w1 + b1)
    a = lrelu(a @ w2 + b2)
    s = lrelu(state @ ws + bs)
    cat = jnp.concatenate([s, a], axis=-1)
    return cat @ wd + bd


if __name__ == "__main__":
    B = 8             # batch
    INPUT_SIZE = 32   # input_size (state feature dim)
    ACTION_SPACE = 8  # action_space

    key = jax.random.PRNGKey(0)
    k_act, k_state, k_params = jax.random.split(key, 3)

    act = jax.random.normal(k_act, (B, ACTION_SPACE), jnp.float32)
    state = jax.random.normal(k_state, (B, INPUT_SIZE), jnp.float32)

    params = init_params(k_params, INPUT_SIZE, ACTION_SPACE)
    kparams = prepare_kernel_params(params, fold=FOLD)

    out = forward_model(act, state, kparams)
    out = jax.block_until_ready(out)

    # The kernel streams activations in bf16; compare against an f32 reference
    # fed the identically rounded inputs.
    act_q = act.astype(jnp.bfloat16).astype(jnp.float32)
    state_q = state.astype(jnp.bfloat16).astype(jnp.float32)
    ref = forward_model_ref(act_q, state_q, params)

    assert out.shape == (B, INPUT_SIZE)
    assert out.dtype == jnp.float32
    assert jnp.allclose(out, ref, atol=1e-2, rtol=1e-2), \
        float(jnp.max(jnp.abs(out - ref)))

    print("KERNEL_OK")
</pallas_src>

<mosaic_0001>
module attributes {stable_mosaic.version = 11 : i64} {
  func.func @forward_model_kernel(%arg0: i32, %arg1: memref<2x32xbf16, #tpu.memory_space<vmem>>, %arg2: memref<2x128xbf16, #tpu.memory_space<vmem>>, %arg3: memref<32x64xf32, #tpu.memory_space<vmem>>, %arg4: memref<1x64xf32, #tpu.memory_space<vmem>>, %arg5: memref<64x128xf32, #tpu.memory_space<vmem>>, %arg6: memref<1x128xf32, #tpu.memory_space<vmem>>, %arg7: memref<128x128xf32, #tpu.memory_space<vmem>>, %arg8: memref<1x128xf32, #tpu.memory_space<vmem>>, %arg9: memref<128x128xf32, #tpu.memory_space<vmem>>, %arg10: memref<128x128xf32, #tpu.memory_space<vmem>>, %arg11: memref<1x128xf32, #tpu.memory_space<vmem>>, %arg12: memref<2x128xf32, #tpu.memory_space<vmem>>) attributes {dimension_semantics = [#tpu.dimension_semantics<parallel>], iteration_bounds = array<i64: 1>, scalar_prefetch = 0 : i64, scratch_operands = 0 : i64, tpu.core_type = #tpu.core_type<tc>, window_params = [{transform_indices = @transform_0, window_bounds = array<i64: 2, 32>}, {transform_indices = @transform_1, window_bounds = array<i64: 2, 128>}, {pipeline_mode = #tpu.pipeline_mode<synchronous>, transform_indices = @transform_2, window_bounds = array<i64: 32, 64>}, {pipeline_mode = #tpu.pipeline_mode<synchronous>, transform_indices = @transform_3, window_bounds = array<i64: 1, 64>}, {pipeline_mode = #tpu.pipeline_mode<synchronous>, transform_indices = @transform_4, window_bounds = array<i64: 64, 128>}, {pipeline_mode = #tpu.pipeline_mode<synchronous>, transform_indices = @transform_5, window_bounds = array<i64: 1, 128>}, {pipeline_mode = #tpu.pipeline_mode<synchronous>, transform_indices = @transform_6, window_bounds = array<i64: 128, 128>}, {pipeline_mode = #tpu.pipeline_mode<synchronous>, transform_indices = @transform_7, window_bounds = array<i64: 1, 128>}, {pipeline_mode = #tpu.pipeline_mode<synchronous>, transform_indices = @transform_8, window_bounds = array<i64: 128, 128>}, {pipeline_mode = #tpu.pipeline_mode<synchronous>, transform_indices = @transform_9, window_bounds = array<i64: 128, 128>}, {pipeline_mode = #tpu.pipeline_mode<synchronous>, transform_indices = @transform_10, window_bounds = array<i64: 1, 128>}, {transform_indices = @transform_11, window_bounds = array<i64: 2, 128>}]} {
    %c0 = arith.constant 0 : index
    %c0_0 = arith.constant 0 : index
    %0 = vector.load %arg1[%c0, %c0_0] : memref<2x32xbf16, #tpu.memory_space<vmem>>, vector<2x32xbf16>
    %1 = arith.extf %0 : vector<2x32xbf16> to vector<2x32xf32>
    %c0_1 = arith.constant 0 : index
    %c0_2 = arith.constant 0 : index
    %2 = vector.load %arg2[%c0_1, %c0_2] : memref<2x128xbf16, #tpu.memory_space<vmem>>, vector<2x128xbf16>
    %3 = arith.extf %2 : vector<2x128xbf16> to vector<2x128xf32>
    %c0_3 = arith.constant 0 : index
    %c0_4 = arith.constant 0 : index
    %4 = vector.load %arg3[%c0_3, %c0_4] : memref<32x64xf32, #tpu.memory_space<vmem>>, vector<32x64xf32>
    %cst = arith.constant dense<0.000000e+00> : vector<2x64xf32>
    %5 = tpu.matmul %1, %4, %cst {dimension_numbers = #tpu.dot_dimension_numbers<[1], [0], [0], [1], [0, 0, 1, 1], [], []>} : vector<2x32xf32>, vector<32x64xf32>, vector<2x64xf32> -> vector<2x64xf32>
    %c0_5 = arith.constant 0 : index
    %c0_6 = arith.constant 0 : index
    %6 = vector.load %arg4[%c0_5, %c0_6] : memref<1x64xf32, #tpu.memory_space<vmem>>, vector<1x64xf32>
    %7 = vector.broadcast %6 : vector<1x64xf32> to vector<2x64xf32>
    %8 = arith.addf %5, %7 : vector<2x64xf32>
    %cst_7 = arith.constant 0.00999999977 : f32
    %9 = vector.broadcast %cst_7 : f32 to vector<2x64xf32>
    %10 = arith.mulf %9, %8 : vector<2x64xf32>
    %11 = arith.maximumf %8, %10 : vector<2x64xf32>
    %c0_8 = arith.constant 0 : index
    %c0_9 = arith.constant 0 : index
    %12 = vector.load %arg5[%c0_8, %c0_9] : memref<64x128xf32, #tpu.memory_space<vmem>>, vector<64x128xf32>
    %cst_10 = arith.constant dense<0.000000e+00> : vector<2x128xf32>
    %13 = tpu.matmul %11, %12, %cst_10 {dimension_numbers = #tpu.dot_dimension_numbers<[1], [0], [0], [1], [0, 0, 1, 1], [], []>} : vector<2x64xf32>, vector<64x128xf32>, vector<2x128xf32> -> vector<2x128xf32>
    %c0_11 = arith.constant 0 : index
    %c0_12 = arith.constant 0 : index
    %14 = vector.load %arg6[%c0_11, %c0_12] : memref<1x128xf32, #tpu.memory_space<vmem>>, vector<1x128xf32>
    %15 = vector.broadcast %14 : vector<1x128xf32> to vector<2x128xf32>
    %16 = arith.addf %13, %15 : vector<2x128xf32>
    %cst_13 = arith.constant 0.00999999977 : f32
    %17 = vector.broadcast %cst_13 : f32 to vector<2x128xf32>
    %18 = arith.mulf %17, %16 : vector<2x128xf32>
    %19 = arith.maximumf %16, %18 : vector<2x128xf32>
    %c0_14 = arith.constant 0 : index
    %c0_15 = arith.constant 0 : index
    %20 = vector.load %arg7[%c0_14, %c0_15] : memref<128x128xf32, #tpu.memory_space<vmem>>, vector<128x128xf32>
    %cst_16 = arith.constant dense<0.000000e+00> : vector<2x128xf32>
    %21 = tpu.matmul %3, %20, %cst_16 {dimension_numbers = #tpu.dot_dimension_numbers<[1], [0], [0], [1], [0, 0, 1, 1], [], []>} : vector<2x128xf32>, vector<128x128xf32>, vector<2x128xf32> -> vector<2x128xf32>
    %c0_17 = arith.constant 0 : index
    %c0_18 = arith.constant 0 : index
    %22 = vector.load %arg8[%c0_17, %c0_18] : memref<1x128xf32, #tpu.memory_space<vmem>>, vector<1x128xf32>
    %23 = vector.broadcast %22 : vector<1x128xf32> to vector<2x128xf32>
    %24 = arith.addf %21, %23 : vector<2x128xf32>
    %cst_19 = arith.constant 0.00999999977 : f32
    %25 = vector.broadcast %cst_19 : f32 to vector<2x128xf32>
    %26 = arith.mulf %25, %24 : vector<2x128xf32>
    %27 = arith.maximumf %24, %26 : vector<2x128xf32>
    %c0_20 = arith.constant 0 : index
    %c0_21 = arith.constant 0 : index
    %28 = vector.load %arg9[%c0_20, %c0_21] : memref<128x128xf32, #tpu.memory_space<vmem>>, vector<128x128xf32>
    %cst_22 = arith.constant dense<0.000000e+00> : vector<2x128xf32>
    %29 = tpu.matmul %27, %28, %cst_22 {dimension_numbers = #tpu.dot_dimension_numbers<[1], [0], [0], [1], [0, 0, 1, 1], [], []>} : vector<2x128xf32>, vector<128x128xf32>, vector<2x128xf32> -> vector<2x128xf32>
    %c0_23 = arith.constant 0 : index
    %c0_24 = arith.constant 0 : index
    %30 = vector.load %arg10[%c0_23, %c0_24] : memref<128x128xf32, #tpu.memory_space<vmem>>, vector<128x128xf32>
    %cst_25 = arith.constant dense<0.000000e+00> : vector<2x128xf32>
    %31 = tpu.matmul %19, %30, %cst_25 {dimension_numbers = #tpu.dot_dimension_numbers<[1], [0], [0], [1], [0, 0, 1, 1], [], []>} : vector<2x128xf32>, vector<128x128xf32>, vector<2x128xf32> -> vector<2x128xf32>
    %32 = arith.addf %29, %31 : vector<2x128xf32>
    %c0_26 = arith.constant 0 : index
    %c0_27 = arith.constant 0 : index
    %33 = vector.load %arg11[%c0_26, %c0_27] : memref<1x128xf32, #tpu.memory_space<vmem>>, vector<1x128xf32>
    %34 = vector.broadcast %33 : vector<1x128xf32> to vector<2x128xf32>
    %35 = arith.addf %32, %34 : vector<2x128xf32>
    %c0_28 = arith.constant 0 : index
    %c0_29 = arith.constant 0 : index
    %36 = vector.load %arg12[%c0_28, %c0_29] : memref<2x128xf32, #tpu.memory_space<vmem>>, vector<2x128xf32>
    tpu.vector_store %arg12[%c0_28, %c0_29], %35 {strides = array<i32>} : memref<2x128xf32, #tpu.memory_space<vmem>>, vector<2x128xf32>,
    return
  }
  func.func @transform_0(%arg0: i32) -> (i32, i32) {
    %c0_i32 = arith.constant 0 : i32
    %c0_i32_0 = arith.constant 0 : i32
    return %arg0, %c0_i32 : i32, i32
  }
  func.func @transform_1(%arg0: i32) -> (i32, i32) {
    %c0_i32 = arith.constant 0 : i32
    %c0_i32_0 = arith.constant 0 : i32
    return %arg0, %c0_i32 : i32, i32
  }
  func.func @transform_2(%arg0: i32) -> (i32, i32) {
    %c0_i32 = arith.constant 0 : i32
    %c0_i32_0 = arith.constant 0 : i32
    %c0_i32_1 = arith.constant 0 : i32
    return %c0_i32, %c0_i32_0 : i32, i32
  }
  func.func @transform_3(%arg0: i32) -> (i32, i32) {
    %c0_i32 = arith.constant 0 : i32
    %c0_i32_0 = arith.constant 0 : i32
    %c0_i32_1 = arith.constant 0 : i32
    return %c0_i32, %c0_i32_0 : i32, i32
  }
  func.func @transform_4(%arg0: i32) -> (i32, i32) {
    %c0_i32 = arith.constant 0 : i32
    %c0_i32_0 = arith.constant 0 : i32
    %c0_i32_1 = arith.constant 0 : i32
    return %c0_i32, %c0_i32_0 : i32, i32
  }
  func.func @transform_5(%arg0: i32) -> (i32, i32) {
    %c0_i32 = arith.constant 0 : i32
    %c0_i32_0 = arith.constant 0 : i32
    %c0_i32_1 = arith.constant 0 : i32
    return %c0_i32, %c0_i32_0 : i32, i32
  }
  func.func @transform_6(%arg0: i32) -> (i32, i32) {
    %c0_i32 = arith.constant 0 : i32
    %c0_i32_0 = arith.constant 0 : i32
    %c0_i32_1 = arith.constant 0 : i32
    return %c0_i32, %c0_i32_0 : i32, i32
  }
  func.func @transform_7(%arg0: i32) -> (i32, i32) {
    %c0_i32 = arith.constant 0 : i32
    %c0_i32_0 = arith.constant 0 : i32
    %c0_i32_1 = arith.constant 0 : i32
    return %c0_i32, %c0_i32_0 : i32, i32
  }
  func.func @transform_8(%arg0: i32) -> (i32, i32) {
    %c0_i32 = arith.constant 0 : i32
    %c0_i32_0 = arith.constant 0 : i32
    %c0_i32_1 = arith.constant 0 : i32
    return %c0_i32, %c0_i32_0 : i32, i32
  }
  func.func @transform_9(%arg0: i32) -> (i32, i32) {
    %c0_i32 = arith.constant 0 : i32
    %c0_i32_0 = arith.constant 0 : i32
    %c0_i32_1 = arith.constant 0 : i32
    return %c0_i32, %c0_i32_0 : i32, i32
  }
  func.func @transform_10(%arg0: i32) -> (i32, i32) {
    %c0_i32 = arith.constant 0 : i32
    %c0_i32_0 = arith.constant 0 : i32
    %c0_i32_1 = arith.constant 0 : i32
    return %c0_i32, %c0_i32_0 : i32, i32
  }
  func.func @transform_11(%arg0: i32) -> (i32, i32) {
    %c0_i32 = arith.constant 0 : i32
    %c0_i32_0 = arith.constant 0 : i32
    return %arg0, %c0_i32 : i32, i32
  }
}

</mosaic_0001>

<bundles_post_ra>
// kernel: forward_model.1
= control target key start
LH: loop header
LB: loop body
LE: loop exit
PB: predicated region body
PF: predicated region fallthrough
CT: control target
= control target key end

     0   :  { %16 = vsyncpa [#allocation3], 0  ;;  %s1173_s0 = inlined_call_operand.vmem [shape: bf16[2,32], index: 0, kind: input, shape index: {}]   ;;  %s1174_s1 = inlined_call_operand.vmem [shape: bf16[2,128], index: 1, kind: input, shape index: {}]   ;;  %s1175_s2 = inlined_call_operand.vmem [shape: f32[32,64], index: 2, kind: input, shape index: {}]   ;;  %s1176_s3 = inlined_call_operand.vmem [shape: f32[1,64], index: 3, kind: input, shape index: {}]   ;;  %s1177_s4 = inlined_call_operand.hbm [shape: f32[64,128], index: 4, kind: input, shape index: {}]   ;;  %s1178_s5 = inlined_call_operand.vmem [shape: f32[1,128], index: 5, kind: input, shape index: {}]   ;;  %s1179_s6 = inlined_call_operand.hbm [shape: f32[128,128], index: 6, kind: input, shape index: {}]   ;;  %s1180_s7 = inlined_call_operand.vmem [shape: f32[1,128], index: 7, kind: input, shape index: {}]   ;;  %s1181_s8 = inlined_call_operand.hbm [shape: f32[128,128], index: 8, kind: input, shape index: {}]   ;;  %s1182_s9 = inlined_call_operand.hbm [shape: f32[128,128], index: 9, kind: input, shape index: {}]   ;;  %s1183_s10 = inlined_call_operand.vmem [shape: f32[1,128], index: 10, kind: input, shape index: {}]   ;;  %s1184_s11 = inlined_call_operand.vmem [shape: f32[2,128], index: 11, kind: output, shape index: {}]  }
   0x1   :  { %17 = vsyncpa [#allocation5], 0 }
   0x2   :  { %18 = vsyncpa [#allocation8], 0  ;;  %s957_s17 = smov [#allocation4]   ;;  %s958_s19 = smov [#allocation2]  }
   0x3   :  { %s46_s18 = sshll.u32 %s957_s17, 4  ;;  %s32_s20 = sshll.u32 %s958_s19, 4  ;;  %s47_s18 = int_to_ptr.vmem [resolvable:$true] %s46_s18  ;;  %s1026_s20 = int_to_ptr.vmem [resolvable:$true] %s32_s20 }
   0x4   :  { %s863_s23 = scalar_lea.hbm %s1179_s6, 2048 }
   0x5   :  { %p864_p0 = scmp.ne.s32.totalorder %s1179_s6, %s863_s23  ;;  %p867_p1 = scmp.lt.u32.totalorder %s863_s23, %s1179_s6 }
   0x7   :  { %p869_p2 = pnand %p867_p1, %p864_p0 }
   0x9   :  { %872 = shalt.err (!%p869_p2)
}
   0xa   :  { %s873_s28 = scalar_lea.vmem %s47_s18, 2048  ;;  %p878_p4 = scmp.lt.s32.totalorder %s47_s18, %s47_s18 }
   0xb   :  { %p874_p3 = scmp.ne.s32.totalorder %s47_s18, %s873_s28  ;;  %p879_p5 = scmp.lt.s32.totalorder %s873_s28, %s873_s28 }
   0xd   :  { %p880_p6 = por %p879_p5, %p878_p4 }
   0xf   :  { %p881_p7 = pnand %p880_p6, %p874_p3 }
  0x11   :  { %884 = shalt.err (!%p881_p7)
}
  0x12   :  { %s959_s29 = smov 128   ;;  %s960_s30 = smov 8  }
  0x13   :  { %52 = dma.hbm_to_vmem [thread:$0]  %s1179_s6, 2048, %s47_s18, [#allocation5], %s959_s29, %s959_s29, %s960_s30  }
  0x14   :  { %s885_s16 = scalar_lea.hbm %s1177_s4, 1024 }
  0x15   :  { %p886_p8 = scmp.ne.s32.totalorder %s1177_s4, %s885_s16  ;;  %p889_p9 = scmp.lt.u32.totalorder %s885_s16, %s1177_s4 }
  0x17   :  { %p891_p10 = pnand %p889_p9, %p886_p8 }
  0x19   :  { %894 = shalt.err (!%p891_p10)
}
  0x1a   :  { %s895_s23 = scalar_lea.vmem %s1026_s20, 1024  ;;  %p900_p12 = scmp.lt.s32.totalorder %s1026_s20, %s1026_s20 }
  0x1b   :  { %p896_p11 = scmp.ne.s32.totalorder %s1026_s20, %s895_s23  ;;  %p901_p13 = scmp.lt.s32.totalorder %s895_s23, %s895_s23 }
  0x1d   :  { %p902_p0 = por %p901_p13, %p900_p12 }
  0x1f   :  { %p903_p1 = pnand %p902_p0, %p896_p11 }
  0x21   :  { %906 = shalt.err (!%p903_p1)
}
  0x22   :  { %38 = dma.hbm_to_vmem [thread:$0]  %s1177_s4, 1024, %s1026_s20, [#allocation3], %s959_s29, %s959_s29, %s960_s30  }
  0x23   :  { %s961_s24 = smov [#allocation6]   ;;  %s962_s26 = smov [#allocation7]  }
  0x24   :  { %s60_s25 = sshll.u32 %s961_s24, 4  ;;  %s72_s27 = sshll.u32 %s962_s26, 4  ;;  %s61_s25 = int_to_ptr.vmem [resolvable:$true] %s60_s25  ;;  %s1063_s27 = int_to_ptr.vmem [resolvable:$true] %s72_s27 }
  0x25   :  { %s907_s13 = scalar_lea.hbm %s1181_s8, 2048 }
  0x26   :  { %p908_p2 = scmp.ne.s32.totalorder %s1181_s8, %s907_s13  ;;  %p911_p3 = scmp.lt.u32.totalorder %s907_s13, %s1181_s8 }
  0x28   :  { %p913_p4 = pnand %p911_p3, %p908_p2 }
  0x2a   :  { %916 = shalt.err (!%p913_p4)
}
  0x2b   :  { %s917_s4 = scalar_lea.vmem %s61_s25, 2048  ;;  %p922_p6 = scmp.lt.s32.totalorder %s61_s25, %s61_s25 }
  0x2c   :  { %p918_p5 = scmp.ne.s32.totalorder %s61_s25, %s917_s4  ;;  %p923_p7 = scmp.lt.s32.totalorder %s917_s4, %s917_s4 }
  0x2e   :  { %p924_p8 = por %p923_p7, %p922_p6 }
  0x30   :  { %p925_p9 = pnand %p924_p8, %p918_p5 }
  0x32   :  { %928 = shalt.err (!%p925_p9)
}
  0x33   :  { %66 = dma.hbm_to_vmem [thread:$0]  %s1181_s8, 2048, %s61_s25, [#allocation5], %s959_s29, %s959_s29, %s960_s30  }
  0x34   :  { %s929_s23 = scalar_lea.hbm %s1182_s9, 2048 }
  0x35   :  { %p930_p10 = scmp.ne.s32.totalorder %s1182_s9, %s929_s23  ;;  %p933_p11 = scmp.lt.u32.totalorder %s929_s23, %s1182_s9 }
  0x37   :  { %p935_p12 = pnand %p933_p11, %p930_p10 }
  0x39   :  { %938 = shalt.err (!%p935_p12)
}
  0x3a   :  { %s939_s28 = scalar_lea.vmem %s1063_s27, 2048  ;;  %p944_p0 = scmp.lt.s32.totalorder %s1063_s27, %s1063_s27 }
  0x3b   :  { %p940_p13 = scmp.ne.s32.totalorder %s1063_s27, %s939_s28  ;;  %p945_p1 = scmp.lt.s32.totalorder %s939_s28, %s939_s28 }
  0x3d   :  { %p946_p2 = por %p945_p1, %p944_p0 }
  0x3f   :  { %p947_p3 = pnand %p946_p2, %p940_p13 }
  0x41   :  { %950 = shalt.err (!%p947_p3)
}
  0x42   :  { %78 = dma.hbm_to_vmem [thread:$0]  %s1182_s9, 2048, %s1063_s27, [#allocation8], %s959_s29, %s959_s29, %s960_s30  }
  0x43   :  { %951 = dma.done.wait [#allocation3], 1024  }
  0x44   :  { %952 = vsyncadd [#allocation3], 4294966272 }
  0x45   :  { %953 = dma.done.wait [#allocation5], 4096  }
  0x46   :  { %954 = vsyncadd [#allocation5], 4294963200 }
  0x47   :  { %955 = dma.done.wait [#allocation8], 2048  }
  0x48   :  { %956 = vsyncadd [#allocation8], 4294965248  ;;  %v963_v0 = vmov 0.0|0.0   ;;  %vm964_vm0 = vmmov 0   ;;  %v965_v1 = vmov 0.0   ;;  %v97_v2 = vld [vmem:[%s1175_s2] sm:$0xff] }
  0x49   :  { %764 = vmatprep.subr.bf16.mxu1 %v963_v0  ;;  %637 = vmatprep.mubr.msk.f32.mxu1 %vm964_vm0, %v965_v1  ;;  %v98_v3 = vld [vmem:[%s1175_s2 + $0x8] sm:$0xff]  ;;  %v99_v4 = vld [vmem:[%s1175_s2 + $0x10] sm:$0xff]  ;;  %v100_v6 = vld [vmem:[%s1175_s2 + $0x18] sm:$0xff]  ;;  %vm108_vm1 = vcmask 261120   ;;  %vm199_vm2 = vcmask 523264  }
  0x4a   :  { %782 = vmatprep.subr.bf16.mxu0 %v963_v0  ;;  %691 = vmatprep.mubr.msk.f32.mxu0 %vm964_vm0, %v965_v1  ;;  %v765_v5 = vpack.c.bf16 %v98_v3, %v97_v2  ;;  %v275_v7 = vld [vmem:[#allocation4] sm:$0xff]  ;;  %v276_v8 = vld [vmem:[#allocation4 + $0x8] sm:$0xff]  ;;  %v277_v9 = vld [vmem:[#allocation4 + $0x10] sm:$0xff]  ;;  %v768_v11 = vpack.c.bf16 %v100_v6, %v99_v4 }
  0x4b   :  { %v278_v10 = vld [vmem:[#allocation4 + $0x18] sm:$0xff]  ;;  %v93_v12 = vld [vmem:[%s1173_s0] sm:$0x1]  ;;  %v783_v13 = vpack.c.bf16 %v276_v8, %v275_v7  ;;  %v185_v16 = vld [vmem:[#allocation2 + $0x8] sm:$0xff] }
  0x4c   :  { %766 = vmatpush3.bf16.msra.mxu1 %v765_v5  ;;  %v786_v14 = vpack.c.bf16 %v278_v10, %v277_v9  ;;  %v184_v15 = vld [vmem:[#allocation2] sm:$0xff]  ;;  %v94_v17 = vunpack.c.l.bf16 %v93_v12  ;;  %v280_v19 = vld [vmem:[#allocation4 + $0x28] sm:$0xff]  ;;  %v186_v21 = vld [vmem:[#allocation2 + $0x10] sm:$0xff] }
  0x4d   :  { %767 = vmatprep.subr.bf16.mxu1 %v963_v0  ;;  %784 = vmatpush3.bf16.msra.mxu0 %v783_v13  ;;  %v279_v18 = vld [vmem:[#allocation4 + $0x20] sm:$0xff]  ;;  %v771_v20 = vpack.c.bf16 %v185_v16, %v184_v15  ;;  %v187_v22 = vld [vmem:[#allocation2 + $0x18] sm:$0xff]  ;;  %v281_v24 = vld [vmem:[#allocation4 + $0x30] sm:$0xff] }
  0x4e   :  { %785 = vmatprep.subr.bf16.mxu0 %v963_v0  ;;  %v789_v23 = vpack.c.bf16 %v280_v19, %v279_v18  ;;  %v282_v25 = vld [vmem:[#allocation4 + $0x38] sm:$0xff]  ;;  %v774_v26 = vpack.c.bf16 %v187_v22, %v186_v21  ;;  %v283_v28 = vld [vmem:[#allocation4 + $0x40] sm:$0xff]  ;;  %v284_v29 = vld [vmem:[#allocation4 + $0x48] sm:$0xff] }
  0x4f   :  { %v792_v27 = vpack.c.bf16 %v282_v25, %v281_v24  ;;  %v795_v30 = vpack.c.bf16 %v284_v29, %v283_v28  ;;  %v285_v31 = vld [vmem:[#allocation4 + $0x50] sm:$0xff]  ;;  %v286_v32 = vld [vmem:[#allocation4 + $0x58] sm:$0xff]  ;;  %v287_v34 = vld [vmem:[#allocation4 + $0x60] sm:$0xff] }
  0x50   :  { %769 = vmatpush3.bf16.msra.mxu1 %v768_v11  ;;  %v798_v33 = vpack.c.bf16 %v286_v32, %v285_v31  ;;  %v288_v35 = vld [vmem:[#allocation4 + $0x68] sm:$0xff]  ;;  %v188_v37 = vld [vmem:[#allocation2 + $0x20] sm:$0xff]  ;;  %v289_v40 = vld [vmem:[#allocation4 + $0x70] sm:$0xff] }
  0x51   :  { %770 = vmatprep.subr.bf16.mxu1 %v963_v0  ;;  %787 = vmatpush3.bf16.msra.mxu0 %v786_v14  ;;  %v801_v36 = vpack.c.bf16 %v288_v35, %v287_v34  ;;  %v189_v38 = vld [vmem:[#allocation2 + $0x28] sm:$0xff]  ;;  %v290_v41 = vld [vmem:[#allocation4 + $0x78] sm:$0xff]  ;;  %v190_v43 = vld [vmem:[#allocation2 + $0x30] sm:$0xff] }
  0x52   :  { %788 = vmatprep.subr.bf16.mxu0 %v963_v0  ;;  %v777_v39 = vpack.c.bf16 %v189_v38, %v188_v37  ;;  %v804_v42 = vpack.c.bf16 %v290_v41, %v289_v40  ;;  %v191_v44 = vld [vmem:[#allocation2 + $0x38] sm:$0xff]  ;;  %v95_v45 = vld [vmem:[%s1174_s1] sm:$0x1]  ;;  %v371_v49 = vld [vmem:[#allocation6 + $0x8] sm:$0xff] }
  0x53   :  { %638 = vmatmul.mubr.msk.f32.vlgmr.msra.gmra.mrb[0].mxu1 %vm108_vm1, %v94_v17  ;;  %v780_v46 = vpack.c.bf16 %v191_v44, %v190_v43  ;;  %v96_v47 = vunpack.c.l.bf16 %v95_v45  ;;  %v370_v48 = vld [vmem:[#allocation6] sm:$0xff]  ;;  %v372_v51 = vld [vmem:[#allocation6 + $0x10] sm:$0xff]  ;;  %v373_v52 = vld [vmem:[#allocation6 + $0x18] sm:$0xff] }
  0x54   :  { %772 = vmatpush3.bf16.msra.mxu1 %v771_v20  ;;  %656 = vmatprep.mubr.msk.f32.mxu1 %vm964_vm0, %v965_v1  ;;  %v831_v50 = vpack.c.bf16 %v371_v49, %v370_v48  ;;  %v834_v53 = vpack.c.bf16 %v373_v52, %v372_v51  ;;  %v374_v54 = vld [vmem:[#allocation6 + $0x20] sm:$0xff]  ;;  %v375_v55 = vld [vmem:[#allocation6 + $0x28] sm:$0xff]  ;;  %v376_v57 = vld [vmem:[#allocation6 + $0x30] sm:$0xff] }
  0x55   :  { %773 = vmatprep.subr.bf16.mxu1 %v963_v0  ;;  %790 = vmatpush3.bf16.msra.mxu0 %v789_v23  ;;  %v837_v56 = vpack.c.bf16 %v375_v55, %v374_v54  ;;  %v377_v58 = vld [vmem:[#allocation6 + $0x38] sm:$0xff]  ;;  %v378_v60 = vld [vmem:[#allocation6 + $0x40] sm:$0xff]  ;;  %v379_v61 = vld [vmem:[#allocation6 + $0x48] sm:$0xff] }
  0x56   :  { %791 = vmatprep.subr.bf16.mxu0 %v963_v0  ;;  %v840_v59 = vpack.c.bf16 %v377_v58, %v376_v57  ;;  %v843_v62 = vpack.c.bf16 %v379_v61, %v378_v60  ;;  %v380_v63 = vld [vmem:[#allocation6 + $0x50] sm:$0xff]  ;;  %v381_v2 = vld [vmem:[#allocation6 + $0x58] sm:$0xff]  ;;  %v382_v4 = vld [vmem:[#allocation6 + $0x60] sm:$0xff] }
  0x57   :  { %v846_v3 = vpack.c.bf16 %v381_v2, %v380_v63  ;;  %v383_v5 = vld [vmem:[#allocation6 + $0x68] sm:$0xff]  ;;  %v558_v7 = vld [vmem:[%s1176_s3] ss:$0 sm:$0xff]  ;;  %v388_v16 = vld [vmem:[#allocation7 + $0x10] sm:$0xff] }
  0x58   :  { %775 = vmatpush3.bf16.msra.mxu1 %v774_v26  ;;  %v849_v6 = vpack.c.bf16 %v383_v5, %v382_v4  ;;  %v386_v11 = vld [vmem:[#allocation7] sm:$0xff]  ;;  %v387_v12 = vld [vmem:[#allocation7 + $0x8] sm:$0xff]  ;;  %v389_v17 = vld [vmem:[#allocation7 + $0x18] sm:$0xff] }
  0x59   :  { %776 = vmatprep.subr.bf16.mxu1 %v963_v0  ;;  %793 = vmatpush3.bf16.msra.mxu0 %v792_v27  ;;  %v807_v14 = vpack.c.bf16 %v387_v12, %v386_v11  ;;  %v810_v18 = vpack.c.bf16 %v389_v17, %v388_v16  ;;  %v390_v19 = vld [vmem:[#allocation7 + $0x20] sm:$0xff]  ;;  %v391_v20 = vld [vmem:[#allocation7 + $0x28] sm:$0xff]  ;;  %v392_v22 = vld [vmem:[#allocation7 + $0x30] sm:$0xff] }
  0x5a   :  { %794 = vmatprep.subr.bf16.mxu0 %v963_v0  ;;  %v813_v21 = vpack.c.bf16 %v391_v20, %v390_v19  ;;  %v393_v23 = vld [vmem:[#allocation7 + $0x38] sm:$0xff]  ;;  %v394_v25 = vld [vmem:[#allocation7 + $0x40] sm:$0xff]  ;;  %v395_v26 = vld [vmem:[#allocation7 + $0x48] sm:$0xff] }
  0x5b   :  { %v816_v24 = vpack.c.bf16 %v393_v23, %v392_v22  ;;  %v819_v27 = vpack.c.bf16 %v395_v26, %v394_v25  ;;  %v397_v28 = vld [vmem:[#allocation7 + $0x58] sm:$0xff]  ;;  %v398_v32 = vld [vmem:[#allocation7 + $0x60] sm:$0xff]  ;;  %v384_v37 = vld [vmem:[#allocation6 + $0x70] sm:$0xff] }
  0x5c   :  { %778 = vmatpush3.bf16.msra.mxu1 %v777_v39  ;;  %v385_v38 = vld [vmem:[#allocation6 + $0x78] sm:$0xff]  ;;  %v400_v41 = vld [vmem:[#allocation7 + $0x70] sm:$0xff]  ;;  %v560_v45 = vld [vmem:[%s1178_s5] ss:$0 sm:$0xff] }
  0x5d   :  { %796 = vmatpush3.bf16.msra.mxu0 %v795_v30  ;;  %779 = vmatprep.subr.bf16.mxu1 %v963_v0  ;;  %v562_v30 = vld [vmem:[%s1180_s7] ss:$0 sm:$0xff]  ;;  %v852_v39 = vpack.c.bf16 %v385_v38, %v384_v37 }
  0x5e   :  { %797 = vmatprep.subr.bf16.mxu0 %v963_v0 }
  0x60   :  { %781 = vmatpush3.bf16.msra.mxu1 %v780_v46 }
  0x61   :  { %799 = vmatpush3.bf16.msra.mxu0 %v798_v33  ;;  %806 = vmatprep.subr.bf16.mxu1 %v963_v0  ;;  %v399_v33 = vld [vmem:[#allocation7 + $0x68] sm:$0xff] }
  0x62   :  { %800 = vmatprep.subr.bf16.mxu0 %v963_v0 }
  0x65   :  { %802 = vmatpush3.bf16.msra.mxu0 %v801_v36  ;;  %v825_v36 = vpack.c.bf16 %v399_v33, %v398_v32 }
  0x66   :  { %803 = vmatprep.subr.bf16.mxu0 %v963_v0 }
  0x69   :  { %805 = vmatpush3.bf16.msra.mxu0 %v804_v42  ;;  %v401_v42 = vld [vmem:[#allocation7 + $0x78] sm:$0xff] }
  0x6a   :  { %830 = vmatprep.subr.bf16.mxu0 %v963_v0  ;;  %v828_v44 = vpack.c.bf16 %v401_v42, %v400_v41 }
  0x6c   :  { %692 = vmatmul.mubr.f32.vlgmr.msra.gmra.mrb[0].mxu0 %v96_v47 }
  0x6d   :  { %761 = vmatprep.mubr.msk.f32.mxu0 %vm964_vm0, %v965_v1  ;;  %832 = vmatpush3.bf16.msra.mxu0 %v831_v50 }
  0x6e   :  { %833 = vmatprep.subr.bf16.mxu0 %v963_v0 }
  0x71   :  { %835 = vmatpush3.bf16.msra.mxu0 %v834_v53 }
  0x72   :  { %836 = vmatprep.subr.bf16.mxu0 %v963_v0 }
  0x75   :  { %838 = vmatpush3.bf16.msra.mxu0 %v837_v56 }
  0x76   :  { %839 = vmatprep.subr.bf16.mxu0 %v963_v0 }
  0x79   :  { %841 = vmatpush3.bf16.msra.mxu0 %v840_v59 }
  0x7a   :  { %842 = vmatprep.subr.bf16.mxu0 %v963_v0 }
  0x7d   :  { %844 = vmatpush3.bf16.msra.mxu0 %v843_v62 }
  0x7e   :  { %845 = vmatprep.subr.bf16.mxu0 %v963_v0 }
  0x81   :  { %847 = vmatpush3.bf16.msra.mxu0 %v846_v3 }
  0x82   :  { %848 = vmatprep.subr.bf16.mxu0 %v963_v0 }
  0x85   :  { %850 = vmatpush3.bf16.msra.mxu0 %v849_v6 }
  0x86   :  { %851 = vmatprep.subr.bf16.mxu0 %v963_v0 }
  0x89   :  { %853 = vmatpush3.bf16.msra.mxu0 %v852_v39 }
 0x126   :  { %v178_v8 = vpop.f32.mrb[0].mxu1 }
 0x127   :  { %v179_v9 = vadd.f32 %v558_v7, %v178_v8  ;;  %v639_v10 = vpop.f32.mrb[1].mxu1 }
 0x129   :  { %v182_v13 = vmul.f32 0.01, %v179_v9 }
 0x12b   :  { %v183_v15 = vmax.f32 %v179_v9, %v182_v13 }
 0x12d   :  { %657 = vmatmul.mubr.msk.f32.vlgmr.msra.gmra.mrb[2].mxu1 %vm199_vm2, %v183_v15 }
 0x12e   :  { %808 = vmatpush3.bf16.msra.mxu1 %v807_v14  ;;  %726 = vmatprep.mubr.msk.f32.mxu1 %vm964_vm0, %v965_v1  ;;  %v396_v1 = vld [vmem:[#allocation7 + $0x50] sm:$0xff] }
 0x12f   :  { %809 = vmatprep.subr.bf16.mxu1 %v963_v0  ;;  %v822_v29 = vpack.c.bf16 %v397_v28, %v396_v1 }
 0x132   :  { %811 = vmatpush3.bf16.msra.mxu1 %v810_v18 }
 0x133   :  { %812 = vmatprep.subr.bf16.mxu1 %v963_v0 }
 0x136   :  { %814 = vmatpush3.bf16.msra.mxu1 %v813_v21 }
 0x137   :  { %815 = vmatprep.subr.bf16.mxu1 %v963_v0 }
 0x13a   :  { %817 = vmatpush3.bf16.msra.mxu1 %v816_v24 }
 0x13b   :  { %818 = vmatprep.subr.bf16.mxu1 %v963_v0 }
 0x13e   :  { %820 = vmatpush3.bf16.msra.mxu1 %v819_v27 }
 0x13f   :  { %821 = vmatprep.subr.bf16.mxu1 %v963_v0  ;;  %v364_v31 = vpop.f32.mrb[0].mxu0 }
 0x140   :  { %v365_v34 = vadd.f32 %v562_v30, %v364_v31  ;;  %v693_v35 = vpop.f32.mrb[1].mxu0 }
 0x142   :  { %823 = vmatpush3.bf16.msra.mxu1 %v822_v29  ;;  %v368_v40 = vmul.f32 0.01, %v365_v34 }
 0x143   :  { %824 = vmatprep.subr.bf16.mxu1 %v963_v0 }
 0x144   :  { %v369_v43 = vmax.f32 %v365_v34, %v368_v40 }
 0x146   :  { %826 = vmatpush3.bf16.msra.mxu1 %v825_v36  ;;  %762 = vmatmul.mubr.f32.vlgmr.msra.gmra.mrb[2].mxu0 %v369_v43 }
 0x147   :  { %827 = vmatprep.subr.bf16.mxu1 %v963_v0  ;;  %v563_v0 = vld [vmem:[%s1183_s10] ss:$0 sm:$0xff] }
 0x14a   :  { %829 = vmatpush3.bf16.msra.mxu1 %v828_v44 }
 0x200   :  { %v269_v46 = vpop.f32.mrb[2].mxu1 }
 0x201   :  { %v270_v47 = vadd.f32 %v560_v45, %v269_v46  ;;  %v658_v48 = vpop.f32.mrb[3].mxu1 }
 0x203   :  { %v273_v49 = vmul.f32 0.01, %v270_v47 }
 0x205   :  { %v274_v50 = vmax.f32 %v270_v47, %v273_v49 }
 0x207   :  { %727 = vmatmul.mubr.f32.vlgmr.msra.gmra.mrb[4].mxu1 %v274_v50 }
 0x219   :  { %v538_v51 = vpop.f32.mrb[2].mxu0 }
 0x21a   :  { %v763_v52 = vpop.f32.mrb[3].mxu0 }
 0x2da   :  { %v468_v53 = vpop.f32.mrb[4].mxu1 }
 0x2db   :  { %v539_v54 = vadd.f32 %v538_v51, %v468_v53  ;;  %v728_v55 = vpop.f32.mrb[5].mxu1 }
 0x2dd   :  { %v549_v56 = vadd.f32 %v563_v0, %v539_v54 }
 0x2df   :  { %550 = vst [vmem:[%s1184_s11] sm:$0x3] %v549_v56 }
 0x2e0   :  { %555 = vsyncpa [#allocation3], 1 }
 0x2e1   :  { %556 = vsyncpa [#allocation5], 1 }
 0x2e2   :  { %557 = vsyncpa [#allocation8], 1 }

</bundles_post_ra>
